<compile_context>
chip_gen: v7x
topology: tpu7x:2x2x1
jax: 0.10.0
libtpu: 0.0.40
codegen_flags: <defaults>
</compile_context>

<pallas_src>
import functools
import math

import jax
import jax.numpy as jnp
from jax.experimental import pallas as pl
from jax.experimental.pallas import tpu as pltpu


# ---------------------------------------------------------------------------
# Helpers.
# ---------------------------------------------------------------------------
def _round_up(n, m):
    return ((n + m - 1) // m) * m


def _round_dim(d, tile):
    """Round to 128; if >= tile, round up to a multiple of `tile` so grid
    tiles never collapse below `tile` (512-tiles ~85% of HBM roofline vs ~29%
    at 128-tiles)."""
    d128 = _round_up(d, 128)
    return d128 if d128 < tile else _round_up(d128, tile)


def _pick_tk(kp, want):
    """Largest tile <= want dividing kp, preferring 512-multiples."""
    t = min(want, kp)
    t -= t % 128
    while kp % t != 0:
        t -= 512 if t > 512 else 128
    return t


def _pad2(a, rows, cols):
    return jnp.pad(a, ((0, rows - a.shape[0]), (0, cols - a.shape[1])))


def _fits_resident(b_rows, b_cols, tm, tk, acc_w, out_w, in_bpe, out_bpe,
                   budget):
    """Conservative VMEM estimate when B is whole-array resident (assume it is
    still double-buffered by the pipeline)."""
    need = (2 * tm * tk * in_bpe            # A tiles (double-buffered)
            + 2 * b_rows * b_cols * in_bpe  # resident B
            + 2 * tm * out_w * out_bpe      # output tiles
            + tm * acc_w * 4)               # f32 accumulator scratch
    return need <= budget


# ---------------------------------------------------------------------------
# Tiled kernels.  Grid = (M // tm, K // tk); K (reduction) axis is last
# ("arbitrary"), rows are "parallel" (megacore / 2 TCs on v7x).
# ---------------------------------------------------------------------------
def _mm_kernel(a_ref, b_ref, bias_ref, o_ref, acc_ref, *, activation,
               b_resident, tk):
    """out = activation(A @ B + bias)."""
    k = pl.program_id(1)

    @pl.when(k == 0)
    def _():
        acc_ref[...] = jnp.zeros_like(acc_ref)

    if b_resident:
        b_blk = b_ref[pl.ds(pl.multiple_of(k * tk, 128), tk), :]
    else:
        b_blk = b_ref[...]
    acc_ref[...] += jnp.dot(a_ref[...], b_blk,
                            preferred_element_type=jnp.float32)

    @pl.when(k == pl.num_programs(1) - 1)
    def _():
        z = acc_ref[...] + bias_ref[...]
        if activation == "relu":
            z = jnp.maximum(z, 0.0)
        elif activation == "log_softmax":
            m = jnp.max(z, axis=-1, keepdims=True)
            lse = m + jnp.log(jnp.sum(jnp.exp(z - m), axis=-1, keepdims=True))
            z = z - lse
        o_ref[...] = z.astype(o_ref.dtype)


def _gc1_fused_kernel(*refs, apply_w1, b_resident, tk):
    """acc = A @ B (over k); finalize: s2 = relu([acc@W1] + b1) @ W2."""
    if apply_w1:
        a_ref, b_ref, w1_ref, b1_ref, w2_ref, o_ref, acc_ref = refs
    else:
        a_ref, b_ref, b1_ref, w2_ref, o_ref, acc_ref = refs
        w1_ref = None
    k = pl.program_id(1)

    @pl.when(k == 0)
    def _():
        acc_ref[...] = jnp.zeros_like(acc_ref)

    if b_resident:
        b_blk = b_ref[pl.ds(pl.multiple_of(k * tk, 128), tk), :]
    else:
        b_blk = b_ref[...]
    acc_ref[...] += jnp.dot(a_ref[...], b_blk,
                            preferred_element_type=jnp.float32)

    @pl.when(k == pl.num_programs(1) - 1)
    def _():
        z = acc_ref[...]
        if apply_w1:
            z = jnp.dot(z.astype(w1_ref.dtype), w1_ref[...],
                        preferred_element_type=jnp.float32)
        h = jnp.maximum(z + b1_ref[...], 0.0)
        s2 = jnp.dot(h.astype(w2_ref.dtype), w2_ref[...],
                     preferred_element_type=jnp.float32)
        o_ref[...] = s2.astype(o_ref.dtype)


def _tiled_call(kernel, a, b, extras, *, out_width, acc_width, out_dtype, tm,
                tk, b_resident, vmem_limit):
    M, K = a.shape
    Pb = b.shape[1]
    assert M % tm == 0 and K % tk == 0
    grid = (M // tm, K // tk)
    a_spec = pl.BlockSpec((tm, tk), lambda i, k: (i, k))
    if b_resident:
        # Whole-array resident B: DMA'd once (constant index map), sliced by k
        # inside the kernel instead of being re-streamed once per row tile.
        b_spec = pl.BlockSpec((K, Pb), lambda i, k: (0, 0))
    else:
        b_spec = pl.BlockSpec((tk, Pb), lambda i, k: (k, 0))
    extra_specs = [pl.BlockSpec(e.shape, lambda i, k: (0, 0)) for e in extras]
    return pl.pallas_call(
        kernel,
        out_shape=jax.ShapeDtypeStruct((M, out_width), out_dtype),
        grid_spec=pltpu.PrefetchScalarGridSpec(
            num_scalar_prefetch=0,
            grid=grid,
            in_specs=[a_spec, b_spec] + extra_specs,
            out_specs=pl.BlockSpec((tm, out_width), lambda i, k: (i, 0)),
            scratch_shapes=[pltpu.VMEM((tm, acc_width), jnp.float32)],
        ),
        compiler_params=pltpu.CompilerParams(
            dimension_semantics=("parallel", "arbitrary"),
            vmem_limit_bytes=vmem_limit,
        ),
    )(a, b, *extras)


def _tiled_matmul(a, b, bias, *, activation, out_dtype, tm, tk, b_resident,
                  vmem_limit):
    kernel = functools.partial(_mm_kernel, activation=activation,
                               b_resident=b_resident, tk=tk)
    out_width = b.shape[1]
    return _tiled_call(kernel, a, b, [bias], out_width=out_width,
                       acc_width=out_width, out_dtype=out_dtype, tm=tm, tk=tk,
                       b_resident=b_resident, vmem_limit=vmem_limit)


def _tiled_adj_gc1(a, b, w1, b1, w2, *, out_width, acc_width, out_dtype, tm,
                   tk, b_resident, vmem_limit):
    apply_w1 = w1 is not None
    kernel = functools.partial(_gc1_fused_kernel, apply_w1=apply_w1,
                               b_resident=b_resident, tk=tk)
    extras = [w1, b1, w2] if apply_w1 else [b1, w2]
    return _tiled_call(kernel, a, b, extras, out_width=out_width,
                       acc_width=acc_width, out_dtype=out_dtype, tm=tm, tk=tk,
                       b_resident=b_resident, vmem_limit=vmem_limit)


# ---------------------------------------------------------------------------
# Tiny-problem path: whole problem fits trivially in VMEM -> one fused block.
# ---------------------------------------------------------------------------
def _gcn_small_kernel(x_ref, adj_ref, w1_ref, b1_ref, w2_ref, b2_ref, out_ref,
                      *, project_first):
    x = x_ref[...]
    adj = adj_ref[...]
    cdt = adj.dtype

    if project_first:
        # adj @ (x @ W1): N^2 matmul contracts over H (H <= F)
        s1 = jnp.dot(x, w1_ref[...], preferred_element_type=jnp.float32)
        h1 = jnp.dot(adj, s1.astype(cdt),
                     preferred_element_type=jnp.float32) + b1_ref[...]
    else:
        # (adj @ x) @ W1: N^2 matmul contracts over F (F < H)
        t = jnp.dot(adj, x, preferred_element_type=jnp.float32)
        h1 = jnp.dot(t.astype(cdt), w1_ref[...],
                     preferred_element_type=jnp.float32) + b1_ref[...]
    h1 = jnp.maximum(h1, 0.0)

    s2 = jnp.dot(h1.astype(cdt), w2_ref[...],
                 preferred_element_type=jnp.float32)
    z = jnp.dot(adj, s2.astype(cdt),
                preferred_element_type=jnp.float32) + b2_ref[...]

    m = jnp.max(z, axis=1, keepdims=True)
    lse = m + jnp.log(jnp.sum(jnp.exp(z - m), axis=1, keepdims=True))
    out_ref[...] = (z - lse).astype(out_ref.dtype)


def _gcn_small(x, adj, w1, b1, w2, b2, *, compute_dtype):
    N, F = x.shape
    H = w1.shape[1]
    C = w2.shape[1]
    cdt = compute_dtype
    project_first = H <= F
    kernel = functools.partial(_gcn_small_kernel, project_first=project_first)
    vmem = pl.BlockSpec(memory_space=pltpu.MemorySpace.VMEM)
    return pl.pallas_call(
        kernel,
        out_shape=jax.ShapeDtypeStruct((N, C), jnp.float32),
        in_specs=[vmem] * 6,
        out_specs=vmem,
        compiler_params=pltpu.CompilerParams(
            vmem_limit_bytes=32 * 1024 * 1024),
    )(x.astype(cdt), adj.astype(cdt), w1.astype(cdt),
      b1.reshape(1, -1).astype(jnp.float32), w2.astype(cdt),
      b2.reshape(1, -1).astype(jnp.float32))


def _small_path_fits(N, F, H, C, compute_dtype):
    """Keep the whole-array-resident path under v5e's 16 MiB default scoped
    VMEM (conservative estimate, f32 intermediates)."""
    bpe = jnp.dtype(compute_dtype).itemsize
    ins = (N * F + N * N + F * H + H * C) * bpe + (H + C) * 4
    inter = (N * max(F, H) + N * H + 2 * N * C) * 4
    return ins + inter <= 6 * 1024 * 1024


# ---------------------------------------------------------------------------
# Tiled path for realistic N.
# ---------------------------------------------------------------------------
def _gcn_tiled(x, adj, w1, b1, w2, b2, *, compute_dtype, tile_m, tile_k):
    assert tile_m % 128 == 0 and tile_k % 128 == 0
    N, F = x.shape
    H = w1.shape[1]
    C = w2.shape[1]
    cdt = compute_dtype
    bpe = jnp.dtype(cdt).itemsize

    F128 = _round_up(F, 128)
    Hp = _round_up(H, 128)
    Cp = _round_up(C, 128)
    # project-first <=> layer-1 N^2 matmul contracts over the narrower of H/F.
    project_first = Hp <= F128
    Np = _round_dim(N, tile_m)                      # rows and adj K dim
    Fp = _round_dim(F, tile_m) if project_first else F128

    tm = tile_m if Np % tile_m == 0 else Np
    tk_n = _pick_tk(Np, tile_k)

    # pad + cast written as one fused expression so adj is rewritten at most
    # once before the kernels run; padded rows/cols are zero so they add
    # nothing to valid output rows.
    adj_p = _pad2(adj, Np, Np).astype(cdt)
    x_p = _pad2(x, Np, Fp).astype(cdt)
    w1_p = _pad2(w1, Fp, Hp).astype(cdt)
    w2_p = _pad2(w2, Hp, Cp).astype(cdt)
    b1_p = jnp.pad(b1.reshape(1, -1).astype(jnp.float32),
                   ((0, 0), (0, Hp - H)))
    # Padded class columns get a huge negative bias so their exp() is exactly
    # 0 in the (f32) log_softmax normalizer.
    b2_p = jnp.pad(b2.reshape(1, -1).astype(jnp.float32),
                   ((0, 0), (0, Cp - C)), constant_values=-1e9)

    vmem_limit = 48 * 1024 * 1024    # fits v7x (64 MiB physical) and below
    budget = 36 * 1024 * 1024        # headroom for weights/bias + spills

    if project_first:
        # Layer-1 projection: s1 = x @ W1   (K = Fp)
        tk_f = _pick_tk(Fp, tile_k)
        res1 = _fits_resident(Fp, Hp, tm, tk_f, Hp, Hp, bpe, bpe, budget)
        s1 = _tiled_matmul(x_p, w1_p, jnp.zeros((1, Hp), jnp.float32),
                           activation="none", out_dtype=cdt, tm=tm, tk=tk_f,
                           b_resident=res1, vmem_limit=vmem_limit)
        # Fused layer-1 aggregate + layer-2 projection:
        #   s2 = relu(adj @ s1 + b1) @ W2
        res2 = _fits_resident(Np, Hp, tm, tk_n, Hp, Cp, bpe, bpe, budget)
        s2 = _tiled_adj_gc1(adj_p, s1, None, b1_p, w2_p, out_width=Cp,
                            acc_width=Hp, out_dtype=cdt, tm=tm, tk=tk_n,
                            b_resident=res2, vmem_limit=vmem_limit)
    else:
        # Fused: s2 = relu((adj @ x) @ W1 + b1) @ W2
        res2 = _fits_resident(Np, Fp, tm, tk_n, Fp, Cp, bpe, bpe, budget)
        s2 = _tiled_adj_gc1(adj_p, x_p, w1_p, b1_p, w2_p, out_width=Cp,
                            acc_width=Fp, out_dtype=cdt, tm=tm, tk=tk_n,
                            b_resident=res2, vmem_limit=vmem_limit)

    # Layer-2 aggregate + log_softmax: out = log_softmax(adj @ s2 + b2)
    res3 = _fits_resident(Np, Cp, tm, tk_n, Cp, Cp, bpe, 4, budget)
    out = _tiled_matmul(adj_p, s2, b2_p, activation="log_softmax",
                        out_dtype=jnp.float32, tm=tm, tk=tk_n,
                        b_resident=res3, vmem_limit=vmem_limit)
    return out[:N, :C]


# ---------------------------------------------------------------------------
# Public entry point.
# ---------------------------------------------------------------------------
def gcn_forward(x, adj, w1, b1, w2, b2, *, compute_dtype=jnp.bfloat16,
                tile_m=512, tile_k=2048, small_threshold=512):
    N, F = x.shape
    H = w1.shape[1]
    C = w2.shape[1]
    if N <= small_threshold and _small_path_fits(N, F, H, C, compute_dtype):
        return _gcn_small(x, adj, w1, b1, w2, b2, compute_dtype=compute_dtype)
    return _gcn_tiled(x, adj, w1, b1, w2, b2, compute_dtype=compute_dtype,
                      tile_m=tile_m, tile_k=tile_k)


def gcn_reference(x, adj, w1, b1, w2, b2):
    h1 = jnp.maximum(adj @ (x @ w1) + b1, 0.0)
    z = adj @ (h1 @ w2) + b2
    return jax.nn.log_softmax(z, axis=1)


# ---------------------------------------------------------------------------
# Self test.
# ---------------------------------------------------------------------------
def _make_inputs(key, N, F, H, C, density):
    kx, kadj, kw1, kb1, kw2, kb2 = jax.random.split(key, 6)
    x = jax.random.normal(kx, (N, F), dtype=jnp.float32)
    a = (jax.random.uniform(kadj, (N, N)) < density).astype(jnp.float32)
    a = jnp.maximum(a, a.T) + jnp.eye(N, dtype=jnp.float32)
    adj = a / jnp.sum(a, axis=1, keepdims=True)
    stdv1 = 1.0 / math.sqrt(H)
    w1 = jax.random.uniform(kw1, (F, H), minval=-stdv1, maxval=stdv1,
                            dtype=jnp.float32)
    b1 = jax.random.uniform(kb1, (H,), minval=-stdv1, maxval=stdv1,
                            dtype=jnp.float32)
    stdv2 = 1.0 / math.sqrt(C)
    w2 = jax.random.uniform(kw2, (H, C), minval=-stdv2, maxval=stdv2,
                            dtype=jnp.float32)
    b2 = jax.random.uniform(kb2, (C,), minval=-stdv2, maxval=stdv2,
                            dtype=jnp.float32)
    return x, adj, w1, b1, w2, b2


if __name__ == "__main__":
    key = jax.random.PRNGKey(0)
    k1, k2, k3 = jax.random.split(key, 3)

    # 1) Tiny path (single fused block), f32 tight + default-bf16 loose.
    small = _make_inputs(k1, N=64, F=16, H=32, C=8, density=0.1)
    ref_s = gcn_reference(*small)
    out_s32 = jax.block_until_ready(
        gcn_forward(*small, compute_dtype=jnp.float32))
    assert out_s32.shape == (64, 8)
    assert jnp.allclose(out_s32, ref_s, atol=1e-4, rtol=1e-4)
    out_sbf = jax.block_until_ready(gcn_forward(*small))   # bf16 default
    assert jnp.allclose(out_sbf, ref_s, atol=5e-2, rtol=5e-2)

    # 2) Tiled path, project-first branch (H <= F), non-128-aligned N
    #    (exercises the pad-to-tile + slice-back path).
    big_a = _make_inputs(k2, N=1000, F=96, H=64, C=10, density=0.05)
    ref_a = gcn_reference(*big_a)
    out_a32 = jax.block_until_ready(
        gcn_forward(*big_a, compute_dtype=jnp.float32))
    assert out_a32.shape == (1000, 10)
    assert jnp.allclose(out_a32, ref_a, atol=1e-4, rtol=1e-4)
    out_abf = jax.block_until_ready(gcn_forward(*big_a))   # bf16 default
    assert jnp.allclose(out_abf, ref_a, atol=5e-2, rtol=5e-2)

    # 3) Tiled path, aggregate-first fused branch (F < H): 2 pallas_calls.
    big_b = _make_inputs(k3, N=1024, F=64, H=200, C=16, density=0.05)
    ref_b = gcn_reference(*big_b)
    out_b32 = jax.block_until_ready(
        gcn_forward(*big_b, compute_dtype=jnp.float32))
    assert out_b32.shape == (1024, 16)
    assert jnp.allclose(out_b32, ref_b, atol=1e-4, rtol=1e-4)
    out_bbf = jax.block_until_ready(gcn_forward(*big_b))   # bf16 default
    assert jnp.allclose(out_bbf, ref_b, atol=5e-2, rtol=5e-2)

    print("KERNEL_OK")
</pallas_src>

<mosaic_0001>
module attributes {stable_mosaic.version = 11 : i64} {
  func.func @_gcn_small_kernel(%arg0: memref<64x16xf32, #tpu.memory_space<vmem>>, %arg1: memref<64x64xf32, #tpu.memory_space<vmem>>, %arg2: memref<16x32xf32, #tpu.memory_space<vmem>>, %arg3: memref<1x32xf32, #tpu.memory_space<vmem>>, %arg4: memref<32x8xf32, #tpu.memory_space<vmem>>, %arg5: memref<1x8xf32, #tpu.memory_space<vmem>>, %arg6: memref<64x8xf32, #tpu.memory_space<vmem>>) attributes {dimension_semantics = [], scalar_prefetch = 0 : i64, scratch_operands = 0 : i64, tpu.core_type = #tpu.core_type<tc>} {
    %c0 = arith.constant 0 : index
    %c0_0 = arith.constant 0 : index
    %0 = vector.load %arg0[%c0, %c0_0] : memref<64x16xf32, #tpu.memory_space<vmem>>, vector<64x16xf32>
    %c0_1 = arith.constant 0 : index
    %c0_2 = arith.constant 0 : index
    %1 = vector.load %arg1[%c0_1, %c0_2] : memref<64x64xf32, #tpu.memory_space<vmem>>, vector<64x64xf32>
    %cst = arith.constant dense<0.000000e+00> : vector<64x16xf32>
    %2 = tpu.matmul %1, %0, %cst {dimension_numbers = #tpu.dot_dimension_numbers<[1], [0], [0], [1], [0, 0, 1, 1], [], []>} : vector<64x64xf32>, vector<64x16xf32>, vector<64x16xf32> -> vector<64x16xf32>
    %c0_3 = arith.constant 0 : index
    %c0_4 = arith.constant 0 : index
    %3 = vector.load %arg2[%c0_3, %c0_4] : memref<16x32xf32, #tpu.memory_space<vmem>>, vector<16x32xf32>
    %cst_5 = arith.constant dense<0.000000e+00> : vector<64x32xf32>
    %4 = tpu.matmul %2, %3, %cst_5 {dimension_numbers = #tpu.dot_dimension_numbers<[1], [0], [0], [1], [0, 0, 1, 1], [], []>} : vector<64x16xf32>, vector<16x32xf32>, vector<64x32xf32> -> vector<64x32xf32>
    %c0_6 = arith.constant 0 : index
    %c0_7 = arith.constant 0 : index
    %5 = vector.load %arg3[%c0_6, %c0_7] : memref<1x32xf32, #tpu.memory_space<vmem>>, vector<1x32xf32>
    %6 = vector.broadcast %5 : vector<1x32xf32> to vector<64x32xf32>
    %7 = arith.addf %4, %6 : vector<64x32xf32>
    %cst_8 = arith.constant 0.000000e+00 : f32
    %8 = vector.broadcast %cst_8 : f32 to vector<64x32xf32>
    %9 = arith.maximumf %7, %8 : vector<64x32xf32>
    %c0_9 = arith.constant 0 : index
    %c0_10 = arith.constant 0 : index
    %10 = vector.load %arg4[%c0_9, %c0_10] : memref<32x8xf32, #tpu.memory_space<vmem>>, vector<32x8xf32>
    %cst_11 = arith.constant dense<0.000000e+00> : vector<64x8xf32>
    %11 = tpu.matmul %9, %10, %cst_11 {dimension_numbers = #tpu.dot_dimension_numbers<[1], [0], [0], [1], [0, 0, 1, 1], [], []>} : vector<64x32xf32>, vector<32x8xf32>, vector<64x8xf32> -> vector<64x8xf32>
    %cst_12 = arith.constant dense<0.000000e+00> : vector<64x8xf32>
    %12 = tpu.matmul %1, %11, %cst_12 {dimension_numbers = #tpu.dot_dimension_numbers<[1], [0], [0], [1], [0, 0, 1, 1], [], []>} : vector<64x64xf32>, vector<64x8xf32>, vector<64x8xf32> -> vector<64x8xf32>
    %c0_13 = arith.constant 0 : index
    %c0_14 = arith.constant 0 : index
    %13 = vector.load %arg5[%c0_13, %c0_14] : memref<1x8xf32, #tpu.memory_space<vmem>>, vector<1x8xf32>
    %14 = vector.broadcast %13 : vector<1x8xf32> to vector<64x8xf32>
    %15 = arith.addf %12, %14 : vector<64x8xf32>
    %cst_15 = arith.constant dense<0xFF800000> : vector<64xf32>
    %16 = vector.multi_reduction <maximumf>, %15, %cst_15 [1] : vector<64x8xf32> to vector<64xf32>
    %17 = vector.shape_cast %16 : vector<64xf32> to vector<64x1xf32>
    %18 = vector.broadcast %17 : vector<64x1xf32> to vector<64x8xf32>
    %19 = arith.subf %15, %18 : vector<64x8xf32>
    %20 = math.exp %19 : vector<64x8xf32>
    %cst_16 = arith.constant dense<0.000000e+00> : vector<64xf32>
    %21 = vector.multi_reduction <add>, %20, %cst_16 [1] : vector<64x8xf32> to vector<64xf32>
    %22 = vector.shape_cast %21 : vector<64xf32> to vector<64x1xf32>
    %23 = math.log %22 : vector<64x1xf32>
    %24 = arith.addf %17, %23 : vector<64x1xf32>
    %25 = vector.broadcast %24 : vector<64x1xf32> to vector<64x8xf32>
    %26 = arith.subf %15, %25 : vector<64x8xf32>
    %c0_17 = arith.constant 0 : index
    %c0_18 = arith.constant 0 : index
    %27 = vector.load %arg6[%c0_17, %c0_18] : memref<64x8xf32, #tpu.memory_space<vmem>>, vector<64x8xf32>
    tpu.vector_store %arg6[%c0_17, %c0_18], %26 {strides = array<i32>} : memref<64x8xf32, #tpu.memory_space<vmem>>, vector<64x8xf32>,
    return
  }
}

</mosaic_0001>

<bundles_post_ra>
// kernel: tpu_custom_call.1
= control target key start
LH: loop header
LB: loop body
LE: loop exit
PB: predicated region body
PF: predicated region fallthrough
CT: control target
= control target key end

     0   :  { %vm39_vm0 = vcmask 523264   ;;  %vm178_vm1 = vcmask 130048   ;;  %vm320_vm2 = vcmask 261120   ;;  %vm562_vm3 = vcmask 64512   ;;  %s1230_s0 = inlined_call_operand.vmem [shape: f32[64,16], index: 0, kind: input, shape index: {}]   ;;  %s1231_s1 = inlined_call_operand.vmem [shape: f32[64,64], index: 1, kind: input, shape index: {}]   ;;  %s1232_s2 = inlined_call_operand.vmem [shape: f32[16,32], index: 2, kind: input, shape index: {}]   ;;  %s1233_s4 = inlined_call_operand.vmem [shape: f32[32,8], index: 4, kind: input, shape index: {}]   ;;  %s1234_s3 = inlined_call_operand.vmem [shape: f32[1,32], index: 3, kind: input, shape index: {}]   ;;  %s1235_s5 = inlined_call_operand.vmem [shape: f32[1,8], index: 5, kind: input, shape index: {}]   ;;  %s1236_s6 = inlined_call_operand.vmem [shape: f32[64,8], index: 6, kind: output, shape index: {}]  }
   0x1   :  { %v23_v0 = vld [vmem:[%s1230_s0] sm:$0xff]  ;;  %v24_v1 = vld [vmem:[%s1230_s0 + $0x8] sm:$0xff]  ;;  %v25_v2 = vld [vmem:[%s1230_s0 + $0x10] sm:$0xff] }
   0x2   :  { %v859_v3 = vpack.c.bf16 %v24_v1, %v23_v0  ;;  %v26_v4 = vld [vmem:[%s1230_s0 + $0x18] sm:$0xff]  ;;  %v27_v6 = vld [vmem:[%s1230_s0 + $0x20] sm:$0xff]  ;;  %v28_v7 = vld [vmem:[%s1230_s0 + $0x28] sm:$0xff] }
   0x3   :  { %v863_v5 = vpack.c.bf16 %v26_v4, %v25_v2  ;;  %v31_v8 = vld [vmem:[%s1231_s1] sm:$0xff]  ;;  %v867_v9 = vpack.c.bf16 %v28_v7, %v27_v6  ;;  %v170_v11 = vld [vmem:[%s1232_s2 + $0x8] sm:$0xff]  ;;  %v29_v12 = vld [vmem:[%s1230_s0 + $0x30] sm:$0xff] }
   0x4   :  { %860 = vmatprep.subr.bf16.mxu0 %v859_v3  ;;  %783 = vmatprep.mubr.msk.f32.mxu0 %vm39_vm0, %v31_v8  ;;  %v169_v10 = vld [vmem:[%s1232_s2] sm:$0xff]  ;;  %v30_v13 = vld [vmem:[%s1230_s0 + $0x38] sm:$0xff]  ;;  %v1015_v16 = vld [vmem:[%s1231_s1 + $0x8] sm:$0xff] }
   0x5   :  { %862 = vmatpush3.bf16.msra.mxu0 %v859_v3  ;;  %v875_v14 = vpack.c.bf16 %v170_v11, %v169_v10  ;;  %v871_v15 = vpack.c.bf16 %v30_v13, %v29_v12  ;;  %v1020_v17 = vld [vmem:[%s1231_s1 + $0x10] sm:$0xff]  ;;  %v1029_v18 = vld [vmem:[%s1231_s1 + $0x18] sm:$0xff]  ;;  %v1034_v19 = vld [vmem:[%s1231_s1 + $0x20] sm:$0xff] }
   0x6   :  { %864 = vmatprep.subr.bf16.mxu0 %v863_v5  ;;  %v1043_v20 = vld [vmem:[%s1231_s1 + $0x28] sm:$0xff]  ;;  %v1048_v21 = vld [vmem:[%s1231_s1 + $0x30] sm:$0xff]  ;;  %v1057_v22 = vld [vmem:[%s1231_s1 + $0x38] sm:$0xff] }
   0x7   :  { %876 = vmatprep.subr.bf16.mxu1 %v875_v14  ;;  %v316_v23 = vld [vmem:[%s1233_s4] sm:$0xff]  ;;  %v317_v24 = vld [vmem:[%s1233_s4 + $0x8] sm:$0xff]  ;;  %v318_v26 = vld [vmem:[%s1233_s4 + $0x10] sm:$0xff] }
   0x8   :  { %878 = vmatpush3.bf16.msra.mxu1 %v875_v14  ;;  %v879_v25 = vpack.c.bf16 %v317_v24, %v316_v23  ;;  %v319_v27 = vld [vmem:[%s1233_s4 + $0x18] sm:$0xff]  ;;  %v687_v37 = vld [vmem:[%s1234_s3] ss:$0 sm:$0xff] }
   0x9   :  { %866 = vmatpush3.bf16.msra.mxu0 %v863_v5  ;;  %v883_v30 = vpack.c.bf16 %v319_v27, %v318_v26  ;;  %v704_v10 = vld [vmem:[%s1235_s5] ss:$0 sm:$0xff] }
   0xa   :  { %868 = vmatprep.subr.bf16.mxu0 %v867_v9  ;;  %880 = vmatprep.subr.bf16.mxu1 %v879_v25 }
   0xd   :  { %870 = vmatpush3.bf16.msra.mxu0 %v867_v9 }
   0xe   :  { %872 = vmatprep.subr.bf16.mxu0 %v871_v15 }
  0x11   :  { %874 = vmatpush3.bf16.msra.mxu0 %v871_v15 }
  0x14   :  { %784 = vmatmul.mubr.msk.f32.vlgmr.msra.gmra.mrb[0].mxu0 %vm39_vm0, %v1015_v16 }
  0x15   :  { %786 = vmatprep.mubr.msk.f32.mxu0 %vm39_vm0, %v1020_v17 }
  0x18   :  { %787 = vmatmul.mubr.msk.f32.gmra.mrb[2].mxu0 %vm39_vm0, %v1029_v18 }
  0x19   :  { %789 = vmatprep.mubr.msk.f32.mxu0 %vm39_vm0, %v1034_v19 }
  0x1c   :  { %790 = vmatmul.mubr.msk.f32.gmra.mrb[4].mxu0 %vm39_vm0, %v1043_v20 }
  0x1d   :  { %792 = vmatprep.mubr.msk.f32.mxu0 %vm39_vm0, %v1048_v21 }
  0x20   :  { %793 = vmatmul.mubr.msk.f32.gmra.mrb[6].mxu0 %vm39_vm0, %v1057_v22 }
  0x21   :  { %847 = vmatprep.mubr.msk.f32.mxu0 %vm39_vm0, %v31_v8 }
  0xe7   :  { %v785_v28 = vpop.f32.mrb[0].mxu0 }
  0xe8   :  { %v130_v29 = vpop.f32.mrb[1].mxu0 }
  0xe9   :  { %799 = vmatprep.mubr.msk.f32.mxu1 %vm178_vm1, %v130_v29 }
  0xea   :  { %800 = vmatmul.mubr.msk.f32.vlgmr.msra.gmra.mrb[0].mxu1 %vm178_vm1, %v785_v28 }
  0xeb   :  { %v788_v31 = vpop.f32.mrb[2].mxu0  ;;  %882 = vmatpush3.bf16.msra.mxu1 %v879_v25 }
  0xec   :  { %v140_v32 = vpop.f32.mrb[3].mxu0  ;;  %884 = vmatprep.subr.bf16.mxu1 %v883_v30 }
  0xed   :  { %802 = vmatprep.mubr.msk.f32.mxu1 %vm178_vm1, %v140_v32 }
  0xee   :  { %803 = vmatmul.mubr.msk.f32.gmra.mrb[2].mxu1 %vm178_vm1, %v788_v31 }
  0xef   :  { %v791_v33 = vpop.f32.mrb[4].mxu0  ;;  %886 = vmatpush3.bf16.msra.mxu1 %v883_v30 }
  0xf0   :  { %v150_v34 = vpop.f32.mrb[5].mxu0 }
  0xf1   :  { %805 = vmatprep.mubr.msk.f32.mxu1 %vm178_vm1, %v150_v34 }
  0xf2   :  { %806 = vmatmul.mubr.msk.f32.gmra.mrb[4].mxu1 %vm178_vm1, %v791_v33 }
  0xf3   :  { %v794_v35 = vpop.f32.mrb[6].mxu0 }
  0xf4   :  { %v160_v36 = vpop.f32.mrb[7].mxu0 }
  0xf5   :  { %808 = vmatprep.mubr.msk.f32.mxu1 %vm178_vm1, %v160_v36 }
  0xf6   :  { %809 = vmatmul.mubr.msk.f32.gmra.mrb[6].mxu1 %vm178_vm1, %v794_v35 }
 0x1bd   :  { %v801_v38 = vpop.f32.mrb[0].mxu1 }
 0x1be   :  { %v275_v39 = vadd.f32 %v801_v38, %v687_v37  ;;  %v269_v40 = vpop.f32.mrb[1].mxu1 }
 0x1bf   :  { %v270_v41 = vadd.f32 %v687_v37, %v269_v40 }
 0x1c0   :  { %v309_v44 = vmax.f32 %v275_v39, 0.0 }
 0x1c1   :  { %v308_v42 = vmax.f32 %v270_v41, 0.0  ;;  %v804_v43 = vpop.f32.mrb[2].mxu1 }
 0x1c2   :  { %v285_v45 = vadd.f32 %v804_v43, %v687_v37  ;;  %v279_v46 = vpop.f32.mrb[3].mxu1 }
 0x1c3   :  { %v280_v47 = vadd.f32 %v687_v37, %v279_v46  ;;  %819 = vmatprep.mubr.msk.f32.mxu1 %vm320_vm2, %v308_v42 }
 0x1c4   :  { %820 = vmatmul.mubr.msk.f32.vlgmr.msra.gmra.mrb[8].mxu1 %vm320_vm2, %v309_v44  ;;  %v311_v50 = vmax.f32 %v285_v45, 0.0 }
 0x1c5   :  { %v310_v48 = vmax.f32 %v280_v47, 0.0  ;;  %v807_v49 = vpop.f32.mrb[4].mxu1 }
 0x1c6   :  { %v295_v51 = vadd.f32 %v807_v49, %v687_v37  ;;  %v289_v52 = vpop.f32.mrb[5].mxu1 }
 0x1c7   :  { %v290_v53 = vadd.f32 %v687_v37, %v289_v52  ;;  %822 = vmatprep.mubr.msk.f32.mxu1 %vm320_vm2, %v310_v48 }
 0x1c8   :  { %823 = vmatmul.mubr.msk.f32.gmra.mrb[10].mxu1 %vm320_vm2, %v311_v50  ;;  %v313_v56 = vmax.f32 %v295_v51, 0.0 }
 0x1c9   :  { %v312_v54 = vmax.f32 %v290_v53, 0.0  ;;  %v810_v55 = vpop.f32.mrb[6].mxu1 }
 0x1ca   :  { %v305_v57 = vadd.f32 %v810_v55, %v687_v37  ;;  %v299_v58 = vpop.f32.mrb[7].mxu1 }
 0x1cb   :  { %v300_v59 = vadd.f32 %v687_v37, %v299_v58  ;;  %825 = vmatprep.mubr.msk.f32.mxu1 %vm320_vm2, %v312_v54 }
 0x1cc   :  { %826 = vmatmul.mubr.msk.f32.gmra.mrb[12].mxu1 %vm320_vm2, %v313_v56  ;;  %v315_v61 = vmax.f32 %v305_v57, 0.0 }
 0x1cd   :  { %v314_v60 = vmax.f32 %v300_v59, 0.0 }
 0x1cf   :  { %828 = vmatprep.mubr.msk.f32.mxu1 %vm320_vm2, %v314_v60 }
 0x1d0   :  { %829 = vmatmul.mubr.msk.f32.gmra.mrb[14].mxu1 %vm320_vm2, %v315_v61 }
 0x1d1   :  { %856 = vmatprep.mubr.msk.f32.mxu1 %vm39_vm0, %v1048_v21 }
 0x297   :  { %v821_v62 = vpop.f32.mrb[8].mxu1 }
 0x298   :  { %v411_v63 = vpop.f32.mrb[9].mxu1 }
 0x299   :  { %v887_v0 = vpack.c.bf16 %v821_v62, %v411_v63 }
 0x29b   :  { %v824_v1 = vpop.f32.mrb[10].mxu1  ;;  %888 = vmatprep.subr.bf16.mxu0 %v887_v0  ;;  %903 = vmatprep.subr.bf16.mxu1 %v887_v0 }
 0x29c   :  { %v421_v2 = vpop.f32.mrb[11].mxu1  ;;  %890 = vmatpush3.bf16.msra.mxu0 %v887_v0  ;;  %907 = vmatpush3.bf16.msra.mxu1 %v887_v0 }
 0x29d   :  { %v891_v3 = vpack.c.bf16 %v824_v1, %v421_v2 }
 0x29f   :  { %v827_v4 = vpop.f32.mrb[12].mxu1  ;;  %892 = vmatprep.subr.bf16.mxu0 %v891_v3  ;;  %904 = vmatprep.subr.bf16.mxu1 %v891_v3 }
 0x2a0   :  { %v431_v5 = vpop.f32.mrb[13].mxu1  ;;  %894 = vmatpush3.bf16.msra.mxu0 %v891_v3  ;;  %908 = vmatpush3.bf16.msra.mxu1 %v891_v3 }
 0x2a1   :  { %v895_v6 = vpack.c.bf16 %v827_v4, %v431_v5 }
 0x2a3   :  { %v830_v7 = vpop.f32.mrb[14].mxu1  ;;  %896 = vmatprep.subr.bf16.mxu0 %v895_v6  ;;  %905 = vmatprep.subr.bf16.mxu1 %v895_v6 }
 0x2a4   :  { %v441_v8 = vpop.f32.mrb[15].mxu1  ;;  %898 = vmatpush3.bf16.msra.mxu0 %v895_v6  ;;  %909 = vmatpush3.bf16.msra.mxu1 %v895_v6 }
 0x2a5   :  { %v899_v9 = vpack.c.bf16 %v830_v7, %v441_v8 }
 0x2a7   :  { %900 = vmatprep.subr.bf16.mxu0 %v899_v9  ;;  %906 = vmatprep.subr.bf16.mxu1 %v899_v9 }
 0x2a8   :  { %902 = vmatpush3.bf16.msra.mxu0 %v899_v9  ;;  %910 = vmatpush3.bf16.msra.mxu1 %v899_v9 }
 0x2ab   :  { %848 = vmatmul.mubr.msk.f32.vlgmr.msra.gmra.mrb[8].mxu0 %vm39_vm0, %v1015_v16  ;;  %857 = vmatmul.mubr.msk.f32.vlgmr.msra.gmra.mrb[16].mxu1 %vm39_vm0, %v1057_v22 }
 0x2ac   :  { %850 = vmatprep.mubr.msk.f32.mxu0 %vm39_vm0, %v1020_v17 }
 0x2af   :  { %851 = vmatmul.mubr.msk.f32.gmra.mrb[10].mxu0 %vm39_vm0, %v1029_v18 }
 0x2b0   :  { %853 = vmatprep.mubr.msk.f32.mxu0 %vm39_vm0, %v1034_v19 }
 0x2b3   :  { %854 = vmatmul.mubr.msk.f32.gmra.mrb[12].mxu0 %vm39_vm0, %v1043_v20 }
 0x37e   :  { %v849_v11 = vpop.f32.mrb[8].mxu0  ;;  %v858_v12 = vpop.f32.mrb[16].mxu1 }
 0x37f   :  { %v1110_v13 = vadd.f32 %v849_v11, %v704_v10  ;;  %v523_v14 = vpop.f32.mrb[9].mxu0  ;;  %v553_v15 = vpop.f32.mrb[17].mxu1  ;;  %v1134_v31 = vadd.f32 %v858_v12, %v704_v10 }
 0x380   :  { %v1112_v16 = vadd.f32 %v704_v10, %v523_v14  ;;  %v1128_v28 = vadd.f32 %v704_v10, %v553_v15 }
 0x381   :  { %v566_v17 = vsel %vm562_vm3, %v1110_v13, -inf  ;;  %v584_v34 = vsel %vm562_vm3, %v1134_v31, -inf }
 0x382   :  { %567 = vmax.xlane.f32.xlu0 %v566_v17  ;;  %v852_v18 = vpop.f32.mrb[10].mxu0  ;;  %v563_v23 = vsel %vm562_vm3, %v1112_v16, -inf  ;;  %v581_v33 = vsel %vm562_vm3, %v1128_v28, -inf }
 0x383   :  { %v1116_v19 = vadd.f32 %v852_v18, %v704_v10  ;;  %v533_v20 = vpop.f32.mrb[11].mxu0 }
 0x384   :  { %v1118_v21 = vadd.f32 %v704_v10, %v533_v20 }
 0x385   :  { %v572_v22 = vsel %vm562_vm3, %v1116_v19, -inf }
 0x386   :  { %573 = vmax.xlane.f32.xlu1 %v572_v22  ;;  %v855_v24 = vpop.f32.mrb[12].mxu0  ;;  %564 = vmax.xlane.f32.xlu0 %v563_v23  ;;  %v569_v29 = vsel %vm562_vm3, %v1118_v21, -inf }
 0x387   :  { %v1124_v25 = vadd.f32 %v855_v24, %v704_v10  ;;  %v543_v26 = vpop.f32.mrb[13].mxu0 }
 0x388   :  { %v1126_v27 = vadd.f32 %v704_v10, %v543_v26 }
 0x389   :  { %v578_v32 = vsel %vm562_vm3, %v1124_v25, -inf }
 0x38a   :  { %570 = vmax.xlane.f32.xlu1 %v569_v29  ;;  %v575_v30 = vsel %vm562_vm3, %v1126_v27, -inf }
 0x38b   :  { %576 = vmax.xlane.f32.xlu0 %v575_v30 }
 0x38e   :  { %579 = vmax.xlane.f32.xlu1 %v578_v32 }
 0x38f   :  { %582 = vmax.xlane.f32.xlu0 %v581_v33 }
 0x392   :  { %585 = vmax.xlane.f32.xlu1 %v584_v34 }
 0x40f   :  { %v1142_v35 = vpop.xlane.xlu0 %567 }
 0x410   :  { %v588_v36 = vsub.f32 %v1110_v13, %v1142_v35 }
 0x412   :  { %v597_v37 = vmul.f32 1.442695, %v588_v36 }
 0x413   :  { %v1146_v38 = vpop.xlane.xlu1 %573  ;;  %v1148_v39 = vpop.xlane.xlu0 %564 }
 0x414   :  { %911 = vpow2.f32 %v597_v37  ;;  %v590_v40 = vsub.f32 %v1116_v19, %v1146_v38  ;;  %v587_v41 = vsub.f32 %v1112_v16, %v1148_v39 }
 0x416   :  { %v601_v42 = vmul.f32 1.442695, %v590_v40  ;;  %v595_v43 = vmul.f32 1.442695, %v587_v41 }
 0x417   :  { %v1154_v44 = vpop.xlane.xlu1 %570 }
 0x418   :  { %913 = vpow2.f32 %v601_v42  ;;  %v589_v45 = vsub.f32 %v1118_v21, %v1154_v44  ;;  %v1158_v46 = vpop.xlane.xlu0 %576 }
 0x419   :  { %915 = vpow2.f32 %v595_v43  ;;  %v591_v47 = vsub.f32 %v1126_v27, %v1158_v46 }
 0x41a   :  { %v599_v48 = vmul.f32 1.442695, %v589_v45 }
 0x41b   :  { %v603_v49 = vmul.f32 1.442695, %v591_v47  ;;  %v1162_v50 = vpop.xlane.xlu1 %579 }
 0x41c   :  { %917 = vpow2.f32 %v599_v48  ;;  %v592_v51 = vsub.f32 %v1124_v25, %v1162_v50  ;;  %v1166_v52 = vpop.xlane.xlu0 %582 }
 0x41d   :  { %v593_v53 = vsub.f32 %v1128_v28, %v1166_v52  ;;  %919 = vpow2.f32 %v603_v49 }
 0x41e   :  { %v912_v54 = vpop.eup %911  ;;  %v605_v55 = vmul.f32 1.442695, %v592_v51 }
 0x41f   :  { %v607_v56 = vmul.f32 1.442695, %v593_v53  ;;  %v1170_v57 = vpop.xlane.xlu1 %585  ;;  %v614_v58 = vsel %vm562_vm3, %v912_v54, 0.0 }
 0x420   :  { %921 = vpow2.f32 %v605_v55  ;;  %v594_v59 = vsub.f32 %v1134_v31, %v1170_v57  ;;  %615 = vadd.xlane.f32.xlu1 %v614_v58 }
 0x421   :  { %923 = vpow2.f32 %v607_v56 }
 0x422   :  { %v914_v60 = vpop.eup %913  ;;  %v609_v61 = vmul.f32 1.442695, %v594_v59 }
 0x423   :  { %v916_v62 = vpop.eup %915  ;;  %v620_v63 = vsel %vm562_vm3, %v914_v60, 0.0 }
 0x424   :  { %925 = vpow2.f32 %v609_v61  ;;  %621 = vadd.xlane.f32.xlu1 %v620_v63  ;;  %v611_v0 = vsel %vm562_vm3, %v916_v62, 0.0 }
 0x425   :  { %612 = vadd.xlane.f32.xlu0 %v611_v0 }
 0x426   :  { %v918_v1 = vpop.eup %917 }
 0x427   :  { %v617_v2 = vsel %vm562_vm3, %v918_v1, 0.0  ;;  %v920_v3 = vpop.eup %919 }
 0x428   :  { %v623_v6 = vsel %vm562_vm3, %v920_v3, 0.0 }
 0x429   :  { %618 = vadd.xlane.f32.xlu0 %v617_v2 }
 0x42a   :  { %v922_v4 = vpop.eup %921 }
 0x42b   :  { %v626_v5 = vsel %vm562_vm3, %v922_v4, 0.0  ;;  %v924_v7 = vpop.eup %923 }
 0x42c   :  { %627 = vadd.xlane.f32.xlu1 %v626_v5  ;;  %v629_v10 = vsel %vm562_vm3, %v924_v7, 0.0 }
 0x42d   :  { %624 = vadd.xlane.f32.xlu0 %v623_v6 }
 0x42e   :  { %v926_v8 = vpop.eup %925 }
 0x42f   :  { %v632_v9 = vsel %vm562_vm3, %v926_v8, 0.0 }
 0x430   :  { %633 = vadd.xlane.f32.xlu1 %v632_v9 }
 0x431   :  { %630 = vadd.xlane.f32.xlu0 %v629_v10 }
 0x4ad   :  { %v616_v11 = vpop.xlane.xlu1 %615 }
 0x4ae   :  { %927 = vlog2.f32 %v616_v11 }
 0x4b1   :  { %v622_v12 = vpop.xlane.xlu1 %621 }
 0x4b2   :  { %929 = vlog2.f32 %v622_v12  ;;  %v613_v14 = vpop.xlane.xlu0 %612 }
 0x4b3   :  { %931 = vlog2.f32 %v613_v14 }
 0x4b6   :  { %v619_v15 = vpop.xlane.xlu0 %618 }
 0x4b7   :  { %933 = vlog2.f32 %v619_v15 }
 0x4b8   :  { %v928_v17 = vpop.eup %927 }
 0x4b9   :  { %v638_v18 = vmul.f32 0.6931472, %v928_v17  ;;  %v628_v20 = vpop.xlane.xlu1 %627 }
 0x4ba   :  { %935 = vlog2.f32 %v628_v20  ;;  %v625_v22 = vpop.xlane.xlu0 %624 }
 0x4bb   :  { %v652_v23 = vadd.f32 %v638_v18, %v1142_v35  ;;  %937 = vlog2.f32 %v625_v22 }
 0x4bc   :  { %v930_v24 = vpop.eup %929 }
 0x4bd   :  { %v932_v26 = vpop.eup %931  ;;  %v660_v29 = vsub.f32 %v1110_v13, %v652_v23  ;;  %v642_v30 = vmul.f32 0.6931472, %v930_v24  ;;  %v634_v32 = vpop.xlane.xlu1 %633 }
 0x4be   :  { %v636_v33 = vmul.f32 0.6931472, %v932_v26  ;;  %939 = vlog2.f32 %v634_v32  ;;  %v631_v34 = vpop.xlane.xlu0 %630 }
 0x4bf   :  { %668 = vst.msk [vmem:[%s1236_s6 + $0x8] sm:$0xff] %vm562_vm3, %v660_v29  ;;  %v654_v36 = vadd.f32 %v642_v30, %v1146_v38  ;;  %941 = vlog2.f32 %v631_v34 }
 0x4c0   :  { %v651_v35 = vadd.f32 %v636_v33, %v1148_v39 }
 0x4c1   :  { %v934_v37 = vpop.eup %933  ;;  %v662_v40 = vsub.f32 %v1116_v19, %v654_v36 }
 0x4c2   :  { %v659_v13 = vsub.f32 %v1112_v16, %v651_v35  ;;  %v640_v41 = vmul.f32 0.6931472, %v934_v37 }
 0x4c3   :  { %670 = vst.msk [vmem:[%s1236_s6 + $0x18] sm:$0xff] %vm562_vm3, %v662_v40 }
 0x4c4   :  { %v936_v42 = vpop.eup %935  ;;  %667 = vst.msk [vmem:[%s1236_s6] sm:$0xff] %vm562_vm3, %v659_v13  ;;  %v653_v38 = vadd.f32 %v640_v41, %v1154_v44 }
 0x4c5   :  { %v938_v39 = vpop.eup %937  ;;  %v646_v43 = vmul.f32 0.6931472, %v936_v42 }
 0x4c6   :  { %v661_v19 = vsub.f32 %v1118_v21, %v653_v38  ;;  %v644_v45 = vmul.f32 0.6931472, %v938_v39 }
 0x4c7   :  { %v656_v16 = vadd.f32 %v646_v43, %v1162_v50 }
 0x4c8   :  { %v940_v47 = vpop.eup %939  ;;  %669 = vst.msk [vmem:[%s1236_s6 + $0x10] sm:$0xff] %vm562_vm3, %v661_v19  ;;  %v655_v48 = vadd.f32 %v644_v45, %v1158_v46 }
 0x4c9   :  { %v942_v49 = vpop.eup %941  ;;  %v664_v51 = vsub.f32 %v1124_v25, %v656_v16  ;;  %v650_v53 = vmul.f32 0.6931472, %v940_v47 }
 0x4ca   :  { %v663_v44 = vsub.f32 %v1126_v27, %v655_v48  ;;  %v648_v54 = vmul.f32 0.6931472, %v942_v49 }
 0x4cb   :  { %672 = vst.msk [vmem:[%s1236_s6 + $0x28] sm:$0xff] %vm562_vm3, %v664_v51  ;;  %v658_v21 = vadd.f32 %v650_v53, %v1170_v57 }
 0x4cc   :  { %671 = vst.msk [vmem:[%s1236_s6 + $0x20] sm:$0xff] %vm562_vm3, %v663_v44  ;;  %v657_v46 = vadd.f32 %v648_v54, %v1166_v52 }
 0x4cd   :  { %v666_v25 = vsub.f32 %v1134_v31, %v658_v21 }
 0x4ce   :  { %v665_v50 = vsub.f32 %v1128_v28, %v657_v46 }
 0x4cf   :  { %674 = vst.msk [vmem:[%s1236_s6 + $0x38] sm:$0xff] %vm562_vm3, %v666_v25 }
 0x4d0   :  { %673 = vst.msk [vmem:[%s1236_s6 + $0x30] sm:$0xff] %vm562_vm3, %v665_v50 }

</bundles_post_ra>
